<compile_context>
chip_gen: v6e
topology: v6e:2x2x1
jax: 0.10.0
libtpu: 0.0.40
codegen_flags: <defaults>
</compile_context>

<pallas_src>
import functools
import math

import jax
import jax.numpy as jnp
import numpy as np
from jax.experimental import pallas as pl
from jax.experimental.pallas import tpu as pltpu

EPS = 1e-5  # nn.LayerNorm default

# Rows of the packed (9, E) bias / LayerNorm slab.
BQ, BK, BV, BO, G1, BE1, B2, G2, BE2 = range(9)


def _layernorm(x, gamma, beta):
    mu = jnp.mean(x, axis=-1, keepdims=True)
    var = jnp.mean((x - mu) ** 2, axis=-1, keepdims=True)
    return (x - mu) * jax.lax.rsqrt(var + EPS) * gamma + beta


_BUFFERED = getattr(pl, "Buffered", None)


def _const_spec(shape):
    """Grid-invariant block (weights / packed vectors): full array, and —
    where supported — single-buffered, since the block never changes across
    the grid and double-buffering it only wastes VMEM (matters on v7x's
    64 MiB)."""
    n = len(shape)
    idx = lambda b, t, _n=n: (0,) * _n
    if _BUFFERED is not None:
        try:
            return pl.BlockSpec(shape, idx, pipeline_mode=_BUFFERED(1))
        except TypeError:  # older jax without pipeline_mode kwarg
            pass
    return pl.BlockSpec(shape, idx)


def _vmem_limit_bytes():
    """Generation-aware VMEM limit: ~52 MiB on v7x (64 MiB physical),
    ~112 MiB on v5e / v6e (128 MiB physical)."""
    try:
        cap = pltpu.get_tpu_info().vmem_capacity_bytes
    except Exception:
        cap = 64 * 1024 * 1024  # conservative fallback, safe on every gen
    return int(max(48 * 1024 * 1024,
                   min(cap - 12 * 1024 * 1024, 112 * 1024 * 1024)))


# ---------------------------------------------------------------------------
# Pass 1: K / V projections, written head-major (B, H, S, D) in bf16 so the
# attention kernel never has to relayout them.  grid = (B, S // TS).
# ---------------------------------------------------------------------------
def kv_proj_kernel(x_ref, wk_ref, wv_ref, vec_ref, k_ref, v_ref, *, heads):
    xb = x_ref[0].astype(jnp.bfloat16)                          # (TS, E)
    TS, E = xb.shape
    D = E // heads
    k = jnp.dot(xb, wk_ref[...], preferred_element_type=jnp.float32) + vec_ref[BK]
    v = jnp.dot(xb, wv_ref[...], preferred_element_type=jnp.float32) + vec_ref[BV]
    # bf16 relayout to head-major; done once per token here instead of once
    # per query tile in the hot kernel.
    k_ref[0] = k.astype(jnp.bfloat16).reshape(TS, heads, D).transpose(1, 0, 2)
    v_ref[0] = v.astype(jnp.bfloat16).reshape(TS, heads, D).transpose(1, 0, 2)


# ---------------------------------------------------------------------------
# Pass 2: fused Q-proj + attention + residual + LN1 + FFN + residual + LN2.
# grid = (B, S // TQ); each step handles one query tile fully in VMEM.
# ---------------------------------------------------------------------------
def encoder_layer_kernel(xq_ref, mask_ref, k_ref, v_ref,
                         wq_ref, wo_ref, w1_ref, w2_ref, vec_ref, b1_ref,
                         out_ref, *, heads, hd_chunk):
    x = xq_ref[0].astype(jnp.float32)                           # (TQ, E) residual/LN path
    TQ, E = x.shape
    D = E // heads

    # --- attention (1/sqrt(D) already folded into Wq / bq in the wrapper) ---
    q = jnp.dot(x.astype(jnp.bfloat16), wq_ref[...],
                preferred_element_type=jnp.float32) + vec_ref[BQ]        # (TQ, E)
    qh = q.astype(jnp.bfloat16).reshape(TQ, heads, D).transpose(1, 0, 2)  # (H,TQ,D) bf16
    kh = k_ref[0]                                               # (H, S, D) bf16 head-major
    vh = v_ref[0]

    # int8 mask -> additive f32 bias, computed once (not per head)
    bias = jnp.where(mask_ref[0].astype(jnp.float32) == 0.0, -1e9, 0.0)   # (TQ, S)

    s = jnp.einsum('hqd,hkd->hqk', qh, kh,
                   preferred_element_type=jnp.float32)                    # (H,TQ,S)
    s = s + bias[None, :, :]
    s = s - jnp.max(s, axis=-1, keepdims=True)
    p = jnp.exp(s)
    p = p * pl.reciprocal(jnp.sum(p, axis=-1, keepdims=True), approx=True)

    ctx = jnp.einsum('hqk,hkd->hqd', p.astype(jnp.bfloat16), vh,
                     preferred_element_type=jnp.float32)                  # (H,TQ,D)
    attn = ctx.astype(jnp.bfloat16).transpose(1, 0, 2).reshape(TQ, E)     # bf16 relayout
    attn = jnp.dot(attn, wo_ref[...],
                   preferred_element_type=jnp.float32) + vec_ref[BO]
    # TODO(synk): dropout omitted (identity in eval mode).
    x1 = _layernorm(x + attn, vec_ref[G1], vec_ref[BE1])        # stays in VMEM (fused)

    # --- feed-forward: Linear -> ReLU -> Linear, chunked over the hidden dim
    # so only a (TQ, hd_chunk) activation slab is live at a time. ---
    x1b = x1.astype(jnp.bfloat16)
    Hd = w1_ref.shape[1]
    y = jnp.zeros((TQ, E), jnp.float32)
    for c in range(Hd // hd_chunk):                             # static trip count
        lo = c * hd_chunk
        h = jnp.dot(x1b, w1_ref[:, lo:lo + hd_chunk],
                    preferred_element_type=jnp.float32) + b1_ref[0, lo:lo + hd_chunk]
        h = jnp.maximum(h, 0.0)
        y = y + jnp.dot(h.astype(jnp.bfloat16), w2_ref[lo:lo + hd_chunk, :],
                        preferred_element_type=jnp.float32)
    y = y + vec_ref[B2]
    out_ref[0] = _layernorm(x1 + y, vec_ref[G2], vec_ref[BE2]).astype(out_ref.dtype)


# ---------------------------------------------------------------------------
# Wrapper
# ---------------------------------------------------------------------------
def encoder_layer(x, mask, params, heads, *, tq=None, ts=None, hd_chunk=None):
    B, S, E = x.shape
    Hd = params['w1'].shape[1]
    D = E // heads
    scale = 1.0 / math.sqrt(D)

    # Tile sizes: >=256-row query tiles fill v6e/v7x's 256-wide MXU at real
    # sizes; clamp to S / Hd for small demos.
    if tq is None:
        tq = min(S, 256)
    if ts is None:
        ts = min(S, 256)
    if hd_chunk is None:
        hd_chunk = min(Hd, 512)
    assert E % heads == 0 and S % tq == 0 and S % ts == 0 and Hd % hd_chunk == 0

    # bf16 weights (native MXU dtype, half the DMA / VMEM); 1/sqrt(D) folded
    # into Wq / bq.  Bias & LayerNorm vectors packed into a single (9, E) slab.
    wq = (params['wq'] * scale).astype(jnp.bfloat16)
    wk = params['wk'].astype(jnp.bfloat16)
    wv = params['wv'].astype(jnp.bfloat16)
    wo = params['wo'].astype(jnp.bfloat16)
    w1 = params['w1'].astype(jnp.bfloat16)
    w2 = params['w2'].astype(jnp.bfloat16)
    vecs = jnp.concatenate([
        params['bq'] * scale, params['bk'], params['bv'], params['bo'],
        params['g1'], params['be1'], params['b2'], params['g2'], params['be2'],
    ], axis=0).astype(jnp.float32)                              # (9, E)
    b1 = params['b1'].astype(jnp.float32)                       # (1, Hd)
    mask_i8 = (mask != 0).astype(jnp.int8)                      # 4x less HBM than f32

    vmem_limit = _vmem_limit_bytes()

    # ---- pass 1: K / V projection, head-major bf16 output ----
    kv_call = pl.pallas_call(
        functools.partial(kv_proj_kernel, heads=heads),
        out_shape=(jax.ShapeDtypeStruct((B, heads, S, D), jnp.bfloat16),
                   jax.ShapeDtypeStruct((B, heads, S, D), jnp.bfloat16)),
        grid=(B, S // ts),
        in_specs=[
            pl.BlockSpec((1, ts, E), lambda b, t: (b, t, 0)),   # x row tile
            _const_spec((E, E)),                                # Wk
            _const_spec((E, E)),                                # Wv
            _const_spec((9, E)),                                # packed vectors
        ],
        out_specs=(pl.BlockSpec((1, heads, ts, D), lambda b, t: (b, 0, t, 0)),
                   pl.BlockSpec((1, heads, ts, D), lambda b, t: (b, 0, t, 0))),
        compiler_params=pltpu.CompilerParams(
            dimension_semantics=("parallel", "parallel"),
            vmem_limit_bytes=vmem_limit),
        cost_estimate=pl.CostEstimate(
            flops=4 * B * S * E * E, transcendentals=0,
            bytes_accessed=B * S * E * 4 + 2 * B * heads * S * D * 2 + 4 * E * E),
    )
    k, v = kv_call(x, wk, wv, vecs)

    # ---- pass 2: fused attention + LN1 + FFN + LN2, tiled over queries ----
    flops = B * (4 * S * E * E + 4 * S * S * E + 4 * S * E * Hd)
    transcendentals = B * heads * S * S + 2 * B * S
    bytes_accessed = (2 * B * S * E * 4 + B * S * S
                      + 2 * B * heads * S * D * 2
                      + (2 * E * E + 2 * E * Hd) * 2 + (9 * E + Hd) * 4)

    enc_call = pl.pallas_call(
        functools.partial(encoder_layer_kernel, heads=heads, hd_chunk=hd_chunk),
        out_shape=jax.ShapeDtypeStruct((B, S, E), x.dtype),
        grid=(B, S // tq),
        in_specs=[
            pl.BlockSpec((1, tq, E), lambda b, q: (b, q, 0)),            # x query tile
            pl.BlockSpec((1, tq, S), lambda b, q: (b, q, 0)),            # mask (int8)
            pl.BlockSpec((1, heads, S, D), lambda b, q: (b, 0, 0, 0)),   # K (full length)
            pl.BlockSpec((1, heads, S, D), lambda b, q: (b, 0, 0, 0)),   # V (full length)
            _const_spec((E, E)),     # Wq (pre-scaled)
            _const_spec((E, E)),     # Wo
            _const_spec((E, Hd)),    # W1
            _const_spec((Hd, E)),    # W2
            _const_spec((9, E)),     # packed bias / LayerNorm vectors
            _const_spec((1, Hd)),    # b1
        ],
        out_specs=pl.BlockSpec((1, tq, E), lambda b, q: (b, q, 0)),
        compiler_params=pltpu.CompilerParams(
            dimension_semantics=("parallel", "parallel"),
            vmem_limit_bytes=vmem_limit),
        cost_estimate=pl.CostEstimate(flops=flops,
                                      transcendentals=transcendentals,
                                      bytes_accessed=bytes_accessed),
    )
    # TODO(synk): for very long sequences add an inner KV loop with online
    # softmax (flash-style) so the (H, TQ, S) score block stays bounded.
    return enc_call(x, mask_i8, k, v, wq, wo, w1, w2, vecs, b1)


# ---------------------------------------------------------------------------
# Pure-JAX reference (matches PyTorch semantics, f32)
# ---------------------------------------------------------------------------
def reference_encoder_layer(x, mask, params, heads):
    B, S, E = x.shape
    D = E // heads
    q = x @ params['wq'] + params['bq'][0]
    k = x @ params['wk'] + params['bk'][0]
    v = x @ params['wv'] + params['bv'][0]
    q = q.reshape(B, S, heads, D).transpose(0, 2, 1, 3)
    k = k.reshape(B, S, heads, D).transpose(0, 2, 1, 3)
    v = v.reshape(B, S, heads, D).transpose(0, 2, 1, 3)
    s = jnp.einsum('bhqd,bhkd->bhqk', q, k) / math.sqrt(D)
    s = jnp.where(mask[:, None] == 0, -1e9, s)
    p = jax.nn.softmax(s, axis=-1)
    ctx = jnp.einsum('bhqk,bhkd->bhqd', p, v)
    ctx = ctx.transpose(0, 2, 1, 3).reshape(B, S, E)
    attn = ctx @ params['wo'] + params['bo'][0]
    x1 = _layernorm(x + attn, params['g1'][0], params['be1'][0])
    h = jnp.maximum(x1 @ params['w1'] + params['b1'][0], 0.0)
    y = h @ params['w2'] + params['b2'][0]
    return _layernorm(x1 + y, params['g2'][0], params['be2'][0])


def init_params(key, embed_size, heads, hidden_dim):
    ks = jax.random.split(key, 6)
    s = 0.02
    return {
        'wq': s * jax.random.normal(ks[0], (embed_size, embed_size), jnp.float32),
        'wk': s * jax.random.normal(ks[1], (embed_size, embed_size), jnp.float32),
        'wv': s * jax.random.normal(ks[2], (embed_size, embed_size), jnp.float32),
        'wo': s * jax.random.normal(ks[3], (embed_size, embed_size), jnp.float32),
        'bq': jnp.zeros((1, embed_size), jnp.float32),
        'bk': jnp.zeros((1, embed_size), jnp.float32),
        'bv': jnp.zeros((1, embed_size), jnp.float32),
        'bo': jnp.zeros((1, embed_size), jnp.float32),
        'w1': s * jax.random.normal(ks[4], (embed_size, hidden_dim), jnp.float32),
        'b1': jnp.zeros((1, hidden_dim), jnp.float32),
        'w2': s * jax.random.normal(ks[5], (hidden_dim, embed_size), jnp.float32),
        'b2': jnp.zeros((1, embed_size), jnp.float32),
        'g1': jnp.ones((1, embed_size), jnp.float32),
        'be1': jnp.zeros((1, embed_size), jnp.float32),
        'g2': jnp.ones((1, embed_size), jnp.float32),
        'be2': jnp.zeros((1, embed_size), jnp.float32),
    }


if __name__ == "__main__":
    # Small demo shapes, chosen so the query grid (2 tiles), the KV row grid
    # (2 tiles) and the FFN hidden-chunk loop (2 chunks) are all exercised.
    B, S, E, HEADS, HIDDEN = 2, 64, 64, 4, 128

    key = jax.random.PRNGKey(0)
    kx, kp = jax.random.split(key)
    x = jax.random.normal(kx, (B, S, E), jnp.float32)
    # Lower-triangular mask (1 = attend, 0 = masked) to exercise masking.
    mask = jnp.broadcast_to(jnp.tril(jnp.ones((S, S), jnp.float32)), (B, S, S))
    params = init_params(kp, E, HEADS, HIDDEN)

    out = encoder_layer(x, mask, params, HEADS, tq=32, ts=32, hd_chunk=64)
    jax.block_until_ready(out)
    assert out.shape == (B, S, E)

    ref = reference_encoder_layer(x, mask, params, HEADS)
    np.testing.assert_allclose(np.asarray(out), np.asarray(ref),
                               atol=5e-2, rtol=5e-2)
    print("KERNEL_OK")
</pallas_src>

<mosaic_0001>
module attributes {stable_mosaic.version = 11 : i64} {
  func.func @kv_proj_kernel(%arg0: i32, %arg1: i32, %arg2: memref<1x32x64xf32, #tpu.memory_space<vmem>>, %arg3: memref<64x64xbf16, #tpu.memory_space<vmem>>, %arg4: memref<64x64xbf16, #tpu.memory_space<vmem>>, %arg5: memref<9x64xf32, #tpu.memory_space<vmem>>, %arg6: memref<1x4x32x16xbf16, #tpu.memory_space<vmem>>, %arg7: memref<1x4x32x16xbf16, #tpu.memory_space<vmem>>) attributes {dimension_semantics = [#tpu.dimension_semantics<parallel>, #tpu.dimension_semantics<parallel>], iteration_bounds = array<i64: 2, 2>, scalar_prefetch = 0 : i64, scratch_operands = 0 : i64, tpu.core_type = #tpu.core_type<tc>, window_params = [{transform_indices = @transform_0, window_bounds = array<i64: 1, 32, 64>}, {pipeline_mode = #tpu.pipeline_mode<synchronous>, transform_indices = @transform_1, window_bounds = array<i64: 64, 64>}, {pipeline_mode = #tpu.pipeline_mode<synchronous>, transform_indices = @transform_2, window_bounds = array<i64: 64, 64>}, {pipeline_mode = #tpu.pipeline_mode<synchronous>, transform_indices = @transform_3, window_bounds = array<i64: 9, 64>}, {transform_indices = @transform_4, window_bounds = array<i64: 1, 4, 32, 16>}, {transform_indices = @transform_5, window_bounds = array<i64: 1, 4, 32, 16>}]} {
    %c0 = arith.constant 0 : index
    %c0_0 = arith.constant 0 : index
    %c0_1 = arith.constant 0 : index
    %0 = vector.load %arg2[%c0, %c0_0, %c0_1] : memref<1x32x64xf32, #tpu.memory_space<vmem>>, vector<1x32x64xf32>
    %1 = vector.shape_cast %0 : vector<1x32x64xf32> to vector<32x64xf32>
    %2 = arith.truncf %1 : vector<32x64xf32> to vector<32x64xbf16>
    %c0_2 = arith.constant 0 : index
    %c0_3 = arith.constant 0 : index
    %3 = vector.load %arg3[%c0_2, %c0_3] : memref<64x64xbf16, #tpu.memory_space<vmem>>, vector<64x64xbf16>
    %cst = arith.constant dense<0.000000e+00> : vector<32x64xf32>
    %4 = tpu.matmul %2, %3, %cst {dimension_numbers = #tpu.dot_dimension_numbers<[1], [0], [0], [1], [0, 0, 1, 1], [], []>} : vector<32x64xbf16>, vector<64x64xbf16>, vector<32x64xf32> -> vector<32x64xf32>
    %c1 = arith.constant 1 : index
    %c0_4 = arith.constant 0 : index
    %5 = vector.load %arg5[%c1, %c0_4] : memref<9x64xf32, #tpu.memory_space<vmem>>, vector<1x64xf32>
    %6 = vector.shape_cast %5 : vector<1x64xf32> to vector<64xf32>
    %7 = vector.shape_cast %6 : vector<64xf32> to vector<1x64xf32>
    %8 = vector.broadcast %7 : vector<1x64xf32> to vector<32x64xf32>
    %9 = arith.addf %4, %8 : vector<32x64xf32>
    %c0_5 = arith.constant 0 : index
    %c0_6 = arith.constant 0 : index
    %10 = vector.load %arg4[%c0_5, %c0_6] : memref<64x64xbf16, #tpu.memory_space<vmem>>, vector<64x64xbf16>
    %cst_7 = arith.constant dense<0.000000e+00> : vector<32x64xf32>
    %11 = tpu.matmul %2, %10, %cst_7 {dimension_numbers = #tpu.dot_dimension_numbers<[1], [0], [0], [1], [0, 0, 1, 1], [], []>} : vector<32x64xbf16>, vector<64x64xbf16>, vector<32x64xf32> -> vector<32x64xf32>
    %c2 = arith.constant 2 : index
    %c0_8 = arith.constant 0 : index
    %12 = vector.load %arg5[%c2, %c0_8] : memref<9x64xf32, #tpu.memory_space<vmem>>, vector<1x64xf32>
    %13 = vector.shape_cast %12 : vector<1x64xf32> to vector<64xf32>
    %14 = vector.shape_cast %13 : vector<64xf32> to vector<1x64xf32>
    %15 = vector.broadcast %14 : vector<1x64xf32> to vector<32x64xf32>
    %16 = arith.addf %11, %15 : vector<32x64xf32>
    %17 = arith.truncf %9 : vector<32x64xf32> to vector<32x64xbf16>
    %18 = vector.shape_cast %17 : vector<32x64xbf16> to vector<32x4x16xbf16>
    %19 = tpu.transpose %18, [1, 0, 2] : vector<32x4x16xbf16> -> vector<4x32x16xbf16>
    %c0_9 = arith.constant 0 : index
    %c0_10 = arith.constant 0 : index
    %c0_11 = arith.constant 0 : index
    %c0_12 = arith.constant 0 : index
    %20 = vector.load %arg6[%c0_9, %c0_10, %c0_11, %c0_12] : memref<1x4x32x16xbf16, #tpu.memory_space<vmem>>, vector<1x4x32x16xbf16>
    %21 = vector.shape_cast %20 : vector<1x4x32x16xbf16> to vector<4x32x16xbf16>
    %22 = vector.shape_cast %19 : vector<4x32x16xbf16> to vector<1x4x32x16xbf16>
    tpu.vector_store %arg6[%c0_9, %c0_10, %c0_11, %c0_12], %22 {strides = array<i32>} : memref<1x4x32x16xbf16, #tpu.memory_space<vmem>>, vector<1x4x32x16xbf16>,
    %23 = arith.truncf %16 : vector<32x64xf32> to vector<32x64xbf16>
    %24 = vector.shape_cast %23 : vector<32x64xbf16> to vector<32x4x16xbf16>
    %25 = tpu.transpose %24, [1, 0, 2] : vector<32x4x16xbf16> -> vector<4x32x16xbf16>
    %c0_13 = arith.constant 0 : index
    %c0_14 = arith.constant 0 : index
    %c0_15 = arith.constant 0 : index
    %c0_16 = arith.constant 0 : index
    %26 = vector.load %arg7[%c0_13, %c0_14, %c0_15, %c0_16] : memref<1x4x32x16xbf16, #tpu.memory_space<vmem>>, vector<1x4x32x16xbf16>
    %27 = vector.shape_cast %26 : vector<1x4x32x16xbf16> to vector<4x32x16xbf16>
    %28 = vector.shape_cast %25 : vector<4x32x16xbf16> to vector<1x4x32x16xbf16>
    tpu.vector_store %arg7[%c0_13, %c0_14, %c0_15, %c0_16], %28 {strides = array<i32>} : memref<1x4x32x16xbf16, #tpu.memory_space<vmem>>, vector<1x4x32x16xbf16>,
    return
  }
  func.func @transform_0(%arg0: i32, %arg1: i32) -> (i32, i32, i32) {
    %c0_i32 = arith.constant 0 : i32
    %c0_i32_0 = arith.constant 0 : i32
    return %arg0, %arg1, %c0_i32 : i32, i32, i32
  }
  func.func @transform_1(%arg0: i32, %arg1: i32) -> (i32, i32) {
    %c0_i32 = arith.constant 0 : i32
    %c0_i32_0 = arith.constant 0 : i32
    %c0_i32_1 = arith.constant 0 : i32
    return %c0_i32, %c0_i32_0 : i32, i32
  }
  func.func @transform_2(%arg0: i32, %arg1: i32) -> (i32, i32) {
    %c0_i32 = arith.constant 0 : i32
    %c0_i32_0 = arith.constant 0 : i32
    %c0_i32_1 = arith.constant 0 : i32
    return %c0_i32, %c0_i32_0 : i32, i32
  }
  func.func @transform_3(%arg0: i32, %arg1: i32) -> (i32, i32) {
    %c0_i32 = arith.constant 0 : i32
    %c0_i32_0 = arith.constant 0 : i32
    %c0_i32_1 = arith.constant 0 : i32
    return %c0_i32, %c0_i32_0 : i32, i32
  }
  func.func @transform_4(%arg0: i32, %arg1: i32) -> (i32, i32, i32, i32) {
    %c0_i32 = arith.constant 0 : i32
    %c0_i32_0 = arith.constant 0 : i32
    %c0_i32_1 = arith.constant 0 : i32
    return %arg0, %c0_i32, %arg1, %c0_i32_0 : i32, i32, i32, i32
  }
  func.func @transform_5(%arg0: i32, %arg1: i32) -> (i32, i32, i32, i32) {
    %c0_i32 = arith.constant 0 : i32
    %c0_i32_0 = arith.constant 0 : i32
    %c0_i32_1 = arith.constant 0 : i32
    return %arg0, %c0_i32, %arg1, %c0_i32_0 : i32, i32, i32, i32
  }
}

</mosaic_0001>

<bundles_post_ra>
// kernel: tpu_custom_call.1
= control target key start
LH: loop header
LB: loop body
LE: loop exit
PB: predicated region body
PF: predicated region fallthrough
CT: control target
= control target key end

     0   :  { %s3070_s0 = inlined_call_operand.hbm [shape: f32[2,64,64], index: 0, kind: input, shape index: {}]   ;;  %s3071_s1 = inlined_call_operand.hbm [shape: bf16[64,64], index: 1, kind: input, shape index: {}]   ;;  %s3072_s2 = inlined_call_operand.hbm [shape: bf16[64,64], index: 2, kind: input, shape index: {}]   ;;  %s3073_s3 = inlined_call_operand.hbm [shape: f32[9,64], index: 3, kind: input, shape index: {}]   ;;  %s3074_s4 = inlined_call_operand.vmem [shape: bf16[2,4,64,16], index: 4, kind: output, shape index: {0}]   ;;  %s3075_s5 = inlined_call_operand.vmem [shape: bf16[2,4,64,16], index: 5, kind: output, shape index: {1}]  }
   0x1   :  { %3082 = sst [smem:[#allocation15_spill]] %s3071_s1 }
   0x2   :  { %3083 = sst [smem:[#allocation16_spill]] %s3072_s2 }
   0x3   :  { %3084 = sst [smem:[#allocation17_spill]] %s3073_s3 }
   0x4   :  { %3085 = sst [smem:[#allocation18_spill]] %s3074_s4 }
   0x5   :  { %3086 = sst [smem:[#allocation19_spill]] %s3075_s5 }
   0x6   :  { %11 = vsyncpa [#allocation3], 0 }
   0x7   :  { %13 = vsyncpa [#allocation3 + $0x1], 0 }
   0x8   :  { %14 = vsyncpa [#allocation5], 0 }
   0x9   :  { %15 = vsyncpa [#allocation8], 0  ;;  %s2543_s18 = smov 0   ;;  %s2545_s19 = smov 0  }
   0xa   :  { %s2547_s20 = smov 0   ;;  %s2549_s21 = smov 0  }
   0xb   :  { %s2551_s22 = smov 0   ;;  %s2553_s23 = smov 0  }
   0xc   :  { %s2555_s24 = smov 0   ;;  %s2557_s25 = smov 0  }
   0xd LB: > { %s2071_s26 = sadd.s32 4294967295, %s2497_s25   ;;  %p55_p0 = scmp.ne.s32.totalorder %s2473_s19, %s2469_s18  ;;  %s2497_s25 = sphi %s2557_s25, %s21_s25   ;;  %s2493_s24 = sphi %s2555_s24, %s3112_s24   ;;  %s2489_s23 = sphi %s2553_s23, %s3111_s23   ;;  %s2485_s22 = sphi %s2551_s22, %s3110_s22   ;;  %s2481_s21 = sphi %s2549_s21, %s3109_s21   ;;  %s2477_s20 = sphi %s2547_s20, %s3108_s20   ;;  %s2473_s19 = sphi %s2545_s19, %s3107_s19   ;;  %s2469_s18 = sphi %s2543_s18, %s3106_s18  }
   0xe   : > { %p2583_p1 = scmp.eq.s32.totalorder %s2071_s26, 0  ;;  %p2587_p2 = scmp.eq.s32.totalorder %s2071_s26, 3 }
   0xf   : > { %p2073_p3 = scmp.ge.s32.totalorder %s2497_s25, 1  ;;  %p185_p4 = scmp.lt.s32.totalorder %s2497_s25, 5 }
  0x10   : > { %s3087_s27 = scalar_select %p2583_p1, 1, 0 }
  0x11   : > { %p2595_p5 = por %p2583_p1, %p55_p0  ;;  %p2599_p6 = pnand %p2073_p3, %p185_p4 }
  0x12   : > { %s2499_s6 = smov [#allocation4]   ;;  %s2500_s9 = smov [#allocation6]  }
  0x13   : > { %s3089_s29 = scalar_select %p2595_p5, 1, 0 }
  0x14   : > { %s197_s7 = sshll.u32 %s2499_s6, 4  ;;  %p2211_p7 = pneg %p2599_p6  ;;  %s198_s7 = int_to_ptr.vmem [resolvable:$true] %s197_s7 }
  0x15   : > { %s210_s10 = sshll.u32 %s2500_s9, 4  ;;  %s2328_s11 = scalar_lea.vmem %s198_s7, 512  ;;  %s211_s10 = int_to_ptr.vmem [resolvable:$true] %s210_s10 }
  0x16   : > { %p2607_p8 = pnand %p2211_p7, %p2583_p1  ;;  %p2329_p10 = scmp.ne.s32.totalorder %s198_s7, %s2328_s11 }
  0x17   : > { %p2336_p13 = scmp.lt.s32.totalorder %s198_s7, %s198_s7  ;;  %p2337_p0 = scmp.lt.s32.totalorder %s2328_s11, %s2328_s11 }
  0x18   : > { %p2319_p9 = pneg %p2607_p8 }
  0x19   : > { %p2338_p3 = por %p2337_p0, %p2336_p13 }
  0x1a   : > { %p2331_p11 = pnand %p2329_p10, %p2319_p9 }
  0x1c   : > { %p2332_p12 = pneg %p2331_p11 }
  0x1e   : > { %p2339_p4 = pnand %p2338_p3, %p2332_p12 }
  0x20   : > { %2342 = shalt.err (!%p2339_p4)
}
  0x21   : > { %s2501_s12 = smov 64   ;;  %s2502_s13 = smov 4  }
  0x22   : > { %s3092_s1 = sld [smem:[#allocation15_spill]]  ;;  %s2354_s16 = scalar_lea.vmem %s211_s10, 512 }
  0x23   : > { %p2355_p7 = scmp.ne.s32.totalorder %s211_s10, %s2354_s16  ;;  %p2362_p1 = scmp.lt.s32.totalorder %s211_s10, %s211_s10 }
  0x24   : > { %p2363_p5 = scmp.lt.s32.totalorder %s2354_s16, %s2354_s16 }
  0x25   : > { %p2357_p10 = pnand %p2355_p7, %p2319_p9 }
  0x26   : > { %p2364_p13 = por %p2363_p5, %p2362_p1 }
  0x27   : > { %p2358_p11 = pneg %p2357_p10 }
  0x28   : > { %2214 = dma.hbm_to_vmem [thread:$0]  (!%p2607_p8), %s3092_s1, 512, %s198_s7, [#allocation5], %s2501_s12, %s2501_s12, %s2502_s13  }
  0x29   : > { %p2365_p12 = pnand %p2364_p13, %p2358_p11 }
  0x2b   : > { %2368 = shalt.err (!%p2365_p12)
}
  0x2c   : > { %s3093_s2 = sld [smem:[#allocation16_spill]]  ;;  %s2503_s26 = smov [#allocation7]  }
  0x2d   : > { %s223_s6 = sshll.u32 %s2503_s26, 4  ;;  %s224_s6 = int_to_ptr.vmem [resolvable:$true] %s223_s6 }
  0x2e   : > { %s2380_s7 = scalar_lea.vmem %s224_s6, 256  ;;  %p2388_p7 = scmp.lt.s32.totalorder %s224_s6, %s224_s6 }
  0x2f   : > { %p2381_p0 = scmp.ne.s32.totalorder %s224_s6, %s2380_s7  ;;  %p2389_p1 = scmp.lt.s32.totalorder %s2380_s7, %s2380_s7 }
  0x31   : > { %p2383_p3 = pnand %p2381_p0, %p2319_p9  ;;  %p2390_p5 = por %p2389_p1, %p2388_p7 }
  0x32   : > { %2217 = dma.hbm_to_vmem [thread:$0]  (!%p2607_p8), %s3093_s2, 512, %s211_s10, [#allocation5], %s2501_s12, %s2501_s12, %s2502_s13  }
  0x33   : > { %p2384_p4 = pneg %p2383_p3 }
  0x35   : > { %p2391_p10 = pnand %p2390_p5, %p2384_p4 }
  0x37   : > { %2394 = shalt.err (!%p2391_p10)
}
  0x38   : > { %s3079_s9 = smov 128   ;;  %s3080_s10 = smov 8  }
  0x39   : > { %s3094_s3 = sld [smem:[#allocation17_spill]]  ;;  %s30_s13 = sadd.s32 1, %s2489_s23 }
  0x3a   : > { %s33_s14 = sadd.s32 1, %s2493_s24  ;;  %p31_p9 = scmp.ge.s32.totalorder %s30_s13, 2 }
  0x3b   : > { %s42_s15 = sadd.s32 1, %s2477_s20  ;;  %p49_p11 = scmp.ne.s32.totalorder %s2477_s20, %s2473_s19 }
  0x3c   : > { %p50_p13 = scmp.eq.s32.totalorder %s2497_s25, 0  ;;  %s3114_s13 = smov (%p31_p9, %s30_s13), 0 }
  0x3d   : > { %3095 = sst [smem:[#allocation14_spill]] %s3114_s13  ;;  %s3116_s14 = smov (!%p31_p9, %s33_s14), %s2493_s24 }
  0x3e   : > { %s38_s8 = ssub.s32 %s2489_s23, %s3114_s13  ;;  %p2651_p12 = por %p50_p13, %p49_p11 }
  0x3f   : > { %2220 = dma.hbm_to_vmem [thread:$0]  (!%p2607_p8), %s3094_s3, 256, %s224_s6, [#allocation8], %s3079_s9, %s3079_s9, %s3080_s10  }
  0x40   : > { %p35_p8 = scmp.ge.s32.totalorder %s3116_s14, 2  ;;  %p2657_p0 = por %p2587_p2, %p49_p11 }
  0x41   : > { %p2228_p3 = scmp.lt.s32.totalorder %s2497_s25, 4  ;;  %s237_s18 = sand.u32 1, %s2477_s20  }
  0x42   : > { %s3118_s14 = smov (%p35_p8, %s3116_s14), 0  ;;  %s2078_s26 = sshll.u32 %s237_s18, 5 }
  0x43   : > { %s37_s6 = ssub.s32 %s2493_s24, %s3118_s14  ;;  %s2079_s11 = sshll.u32 %s2489_s23, 2 }
  0x44   : > { %s39_s7 = sor.u32 %s38_s8, %s37_s6  ;;  %s2080_s12 = sshll.u32 %s2493_s24, 3 }
  0x45   : > { %p40_p4 = scmp.eq.s32.totalorder %s39_s7, 0  ;;  %s247_s9 = sadd.s32 %s2080_s12, %s2079_s11 }
  0x46   : > { %s241_s10 = scalar_lea.vmem [#allocation2], %s2078_s26  ;;  %s2081_s2 = sshll.u32 %s247_s9, 7 }
  0x47   : > { %s250_s28 = sshll.u32 %s241_s10, 4  ;;  %s249_s5 = scalar_lea.hbm %s3070_s0, %s2081_s2  ;;  %s251_s28 = int_to_ptr.vmem [resolvable:$true] %s250_s28 }
  0x48   : > { %s2670_s1 = scalar_select %p40_p4, %s2477_s20, %s42_s15  }
  0x49   : > { %p2679_p2 = pnand %p2228_p3, %p2651_p12  ;;  %s238_s8 = scalar_lea.sflag [#allocation3], %s237_s18 }
  0x4a   : > { %s2408_s26 = scalar_lea.vmem %s251_s28, 512  ;;  %s2506_s9 = smov [#allocation2]  }
  0x4b   : > { %p2397_p7 = pneg %p2679_p2  ;;  %p2409_p1 = scmp.ne.s32.totalorder %s251_s28, %s2408_s26 }
  0x4c   : > { %s2413_s10 = sshll.u32 %s2506_s9, 4  ;;  %s2414_s10 = int_to_ptr.vmem [resolvable:$false] %s2413_s10 }
  0x4d   : > { %p2411_p5 = pnand %p2409_p1, %p2397_p7  ;;  %s2415_s15 = scalar_lea.vmem %s2414_s10, 1024 }
  0x4e   : > { %p2416_p9 = scmp.lt.s32.totalorder %s251_s28, %s2414_s10  ;;  %p2417_p11 = scmp.lt.s32.totalorder %s2415_s15, %s2408_s26 }
  0x4f   : > { %p2412_p10 = pneg %p2411_p5 }
  0x50   : > { %p2418_p13 = por %p2417_p11, %p2416_p9 }
  0x52   : > { %p2419_p8 = pnand %p2418_p13, %p2412_p10 }
  0x54   : > { %2422 = shalt.err (!%p2419_p8)
}
  0x55   : > { %s3099_s2 = smov 8   ;;  %s3100_s3 = smov 128  }
  0x56   : > { %2224 = dma.hbm_to_vmem [thread:$0]  (!%p2679_p2), %s249_s5, 512, %s251_s28, %s238_s8, %s3100_s3, %s3100_s3, %s3099_s2  }
  0x57   : > { %262 = sbr.rel (%p2599_p6) target bundleno = 537 (0x219), region = 36  ;;  %s2693_s13 = sand.u32 (!%p2599_p6), 1, %s2473_s19  }
  0x58   : > { %s2083_s16 = sshll.u32 (!%p2599_p6), %s2693_s13, 5  ;;  %s265_s18 = scalar_lea.sflag (!%p2599_p6), [#allocation3], %s2693_s13 }
  0x59   : > { %s2697_s6 = scalar_lea.vmem (!%p2599_p6), [#allocation2], %s2083_s16  ;;  %p3101_p12 = scmp.ne.s32.totalorder (!%p2599_p6), %s3089_s29, 0 }
  0x5c   : > { %2456 = dma.done.wait (%p3101_p12), %s265_s18, 512  }
  0x5d   : > { %2458 = vsyncadd (%p3101_p12), %s265_s18, 4294966784  ;;  %p3102_p3 = scmp.ne.s32.totalorder %s3087_s27, 0 }
  0x5f   : > { %2460 = dma.done.wait (%p3102_p3), [#allocation5], 1024  }
  0x60   : > { %2462 = vsyncadd (%p3102_p3), [#allocation5], 4294966272 }
  0x61   : > { %2464 = dma.done.wait (%p3102_p3), [#allocation8], 256  }
  0x62   : > { %2466 = vsyncadd (%p3102_p3), [#allocation8], 4294967040  ;;  %v2309_v0 = vld [vmem:[#allocation4 + $0x18] sm:$0xff]   ;;  %v2311_v2 = vld [vmem:[#allocation4 + $0x10] sm:$0xff]   ;;  %vm357_vm0 = vcmask 523264   ;;  %s2507_s4 = smov 96   ;;  %v557_v38 = vlaneseq }
  0x63   : > { %v2310_v1 = vld [vmem:[#allocation6 + $0x18] sm:$0xff]   ;;  %2173 = vmatprep.subr.bf16.mxu0 %v2309_v0  ;;  %v2312_v3 = vld [vmem:[#allocation6 + $0x10] sm:$0xff]   ;;  %v2313_v4 = vld [vmem:[#allocation4 + $0x8] sm:$0xff]   ;;  %s2508_s5 = smov 112   ;;  %s2509_s27 = smov 80   ;;  %v2512_v43 = vmov 0  }
  0x64   : > { %2174 = vmatpush3.bf16.msra.mxu0 %v2309_v0  ;;  %2185 = vmatprep.subr.bf16.mxu1 %v2310_v1  ;;  %v2314_v5 = vld [vmem:[#allocation6 + $0x8] sm:$0xff]   ;;  %v2315_v6 = vld [vmem:[#allocation4] sm:$0xff]   ;;  %v316_v11 = vld [vmem:[%s2697_s6 + $0x10] sm:$0xff]  ;;  %v2510_v36 = vmov 1983009808   ;;  %v558_v42 = vshrl.u32 %v557_v38, 7  ;;  %v2729_v44 = vpack.i.b16 %v2512_v43, %v2512_v43 }
  0x65   : > { %2186 = vmatpush3.bf16.msra.mxu1 %v2310_v1  ;;  %2175 = vmatprep.subr.bf16.mxu0 %v2311_v2  ;;  %v314_v7 = vld [vmem:[%s2697_s6] sm:$0xff]  ;;  %v315_v8 = vld [vmem:[%s2697_s6 + $0x8] sm:$0xff]  ;;  %v317_v12 = vld [vmem:[%s2697_s6 + $0x18] sm:$0xff]  ;;  %v555_v37 = vunpack.c.l.s4 %v2510_v36  ;;  %v2511_v39 = vmov 1934713408   ;;  %vm1089_vm1 = vcmask 125952  }
  0x66   : > { %2187 = vmatprep.subr.bf16.mxu1 %v2312_v3  ;;  %v2316_v9 = vld [vmem:[#allocation6] sm:$0xff]   ;;  %v318_v10 = vpack.c.bf16 %v315_v8, %v314_v7  ;;  %v319_v13 = vpack.c.bf16 %v317_v12, %v316_v11  ;;  %v586_v40 = vunpack.c.l.s4 %v2511_v39  ;;  %s2087_s29 = sshll.u32 %s2693_s13, 6  ;;  %s2153_s11 = sshll.u32 (%p2657_p0), %s2481_s21, 2 }
  0x67   : > { %v2089_v16 = vld [vmem:[#allocation7 + $0x1] ss:$0 sm:$0xff]  ;;  %v2096_v25 = vld [vmem:[#allocation7 + $0x2] ss:$0 sm:$0xff]  ;;  %v556_v41 = vunpack.c.0.s8 %v555_v37  ;;  %s2834_s30 = scalar_lea.vmem [#allocation9], %s2087_s29  ;;  %s2972_s7 = scalar_lea.vmem [#allocation10], %s2087_s29 }
  0x68   : > { %2176 = vmatpush3.bf16.msra.mxu0 %v2311_v2  ;;  %2181 = vmatprep.mubr.msk.bf16.mxu0 %vm357_vm0, %v318_v10  ;;  %v587_v47 = vunpack.c.0.s8 %v586_v40  ;;  %s2154_s12 = sshll.u32 (%p2657_p0), %s2485_s22, 5  ;;  %s3103_s10 = sld [smem:[#allocation18_spill]] (%p2657_p0) }
  0x69   : > { %2188 = vmatpush3.bf16.msra.mxu1 %v2312_v3  ;;  %2177 = vmatprep.subr.bf16.mxu0 %v2313_v4  ;;  %v2731_v48 = vsub.s32 %v556_v41, %v558_v42  ;;  %s1719_s28 = sadd.s32 (%p2657_p0), %s2154_s12, %s2153_s11 }
  0x6a   : > { %2189 = vmatprep.subr.bf16.mxu1 %v2314_v5  ;;  %2193 = vmatprep.mubr.msk.bf16.mxu1 %vm357_vm0, %v318_v10  ;;  %v2734_v54 = vsub.s32 %v587_v47, %v558_v42  ;;  %s2155_s8 = sshll.u32 (%p2657_p0), %s1719_s28, 2 }
  0x6c   : > { %2178 = vmatpush3.bf16.msra.mxu0 %v2313_v4 }
  0x6d   : > { %2190 = vmatpush3.bf16.msra.mxu1 %v2314_v5  ;;  %2179 = vmatprep.subr.bf16.mxu0 %v2315_v6 }
  0x6e   : > { %2191 = vmatprep.subr.bf16.mxu1 %v2316_v9  ;;  %s1721_s15 = scalar_lea.vmem (%p2657_p0), %s3103_s10, %s2155_s8 }
  0x70   : > { %2180 = vmatpush3.bf16.msra.mxu0 %v2315_v6 }
  0x71   : > { %2192 = vmatpush3.bf16.msra.mxu1 %v2316_v9 }
  0x73   : > { %2182 = vmatmul.mubr.msk.bf16.vlgmr.msra.gmra.mxu0 %vm357_vm0, %v319_v13 }
  0x74   : > { %2194 = vmatmul.mubr.msk.bf16.vlgmr.msra.gmra.mxu1 %vm357_vm0, %v319_v13 }
 0x133   : > { %v2183_v14 = vpop.f32.mrf.mxu0 }
 0x134   : > { %v2195_v15 = vpop.f32.mrf.mxu1  ;;  %v407_v20 = vadd.f32 %v2183_v14, %v2089_v16 }
 0x135   : > { %v398_v17 = vpop.f32.mrf.mxu0  ;;  %v493_v28 = vadd.f32 %v2195_v15, %v2096_v25 }
 0x136   : > { %v484_v19 = vpop.f32.mrf.mxu1  ;;  %v399_v27 = vadd.f32 %v2089_v16, %v398_v17 }
 0x137   : > { %v2184_v18 = vpop.f32.mrf.mxu0  ;;  %v485_v32 = vadd.f32 %v2096_v25, %v484_v19 }
 0x138   : > { %v410_v21 = vadd.f32 %v2184_v18, %v2089_v16  ;;  %v2196_v26 = vpop.f32.mrf.mxu1 }
 0x139   : > { %v401_v22 = vpop.f32.mrf.mxu0  ;;  %v496_v30 = vadd.f32 %v2196_v26, %v2096_v25 }
 0x13a   : > { %v500_v23 = vpack.c.bf16 %v410_v21, %v407_v20  ;;  %v402_v24 = vadd.f32 %v2089_v16, %v401_v22  ;;  %v487_v31 = vpop.f32.mrf.mxu1 }
 0x13b   : > { %v2719_v33 = vpack.c.bf16 %v496_v30, %v493_v28  ;;  %v488_v34 = vadd.f32 %v2096_v25, %v487_v31 }
 0x13c   : > { %509 = vrot.lane.b32.xlu1 %v500_v23, %s2507_s4  ;;  %505 = vrot.lane.b32.xlu0 %v500_v23, %s2508_s5  ;;  %v499_v29 = vpack.c.bf16 %v402_v24, %v399_v27  ;;  %v541_v50 = vshrl.u32 %v500_v23, 16 }
 0x13d   : > { %v2722_v35 = vpack.c.bf16 %v488_v34, %v485_v32  ;;  %v1142_v58 = vshrl.u32 %v2719_v33, 16 }
 0x13e   : > { %v519_v57 = vshrl.u32 %v499_v29, 16 }
 0x13f   : > { %v1126_v59 = vshrl.u32 %v2722_v35, 16 }
 0x140   : > { %513 = vrot.lane.b32.xlu1 %v500_v23, %s2509_s27  ;;  %503 = vrot.lane.b32.xlu0 %v499_v29, %s2508_s5 }
 0x144   : > { %1112 = vrot.lane.b32.xlu1 %v2719_v33, %s2508_s5  ;;  %511 = vrot.lane.b32.xlu0 %v499_v29, %s2509_s27 }
 0x148   : > { %1116 = vrot.lane.b32.xlu1 %v2719_v33, %s2507_s4  ;;  %1110 = vrot.lane.b32.xlu0 %v2722_v35, %s2508_s5 }
 0x14c   : > { %507 = vrot.lane.b32.xlu1 %v499_v29, %s2507_s4  ;;  %1114 = vrot.lane.b32.xlu0 %v2722_v35, %s2507_s4 }
 0x150   : > { %1120 = vrot.lane.b32.xlu1 %v2719_v33, %s2509_s27  ;;  %1118 = vrot.lane.b32.xlu0 %v2722_v35, %s2509_s27 }
 0x1ae   : > { %v510_v45 = vpop.permute.xlu1 %509  ;;  %v506_v46 = vpop.permute.xlu0 %505 }
 0x1af   : > { %v539_v49 = vpack.i.b16 %v506_v46, %v500_v23  ;;  %v542_v51 = vshrl.u32 %v506_v46, 16  ;;  %v549_v60 = vshrl.u32 %v510_v45, 16 }
 0x1b1   : > { %v543_v52 = vpack.i.b16 %v542_v51, %v541_v50  ;;  %v685_v53 = vcombine.high %v539_v49, %v2729_v44  ;;  %v692_v61 = vrot.slane %v539_v49, %v2731_v48 }
 0x1b2   : > { %v514_v55 = vpop.permute.xlu1 %513  ;;  %v504_v56 = vpop.permute.xlu0 %503 }
 0x1b3   : > { %v751_v62 = vcombine.high %v543_v52, %v2729_v44  ;;  %v547_v63 = vpack.i.b16 %v514_v55, %v510_v45  ;;  %v699_v0 = vrot.slane %v685_v53, %v2731_v48  ;;  %v550_v1 = vshrl.u32 %v514_v55, 16 }
 0x1b4   : > { %v517_v2 = vpack.i.b16 %v504_v56, %v499_v29  ;;  %v520_v3 = vshrl.u32 %v504_v56, 16  ;;  %v758_v4 = vrot.slane %v543_v52, %v2731_v48 }
 0x1b5   : > { %v765_v5 = vrot.slane %v751_v62, %v2731_v48  ;;  %v700_v6 = vcombine.high %v547_v63, %v2729_v44  ;;  %v707_v7 = vrot.slane %v547_v63, %v2731_v48  ;;  %v551_v8 = vpack.i.b16 %v550_v1, %v549_v60 }
 0x1b6   : > { %v521_v9 = vpack.i.b16 %v520_v3, %v519_v57  ;;  %v553_v10 = vcombine.high %v517_v2, %v2729_v44  ;;  %v2747_v11 = vrot.slane %v517_v2, %v2731_v48  ;;  %v1113_v12 = vpop.permute.xlu1 %1112  ;;  %v2763_v29 = vpop.permute.xlu0 %511 }
 0x1b7   : > { %v714_v13 = vrot.slane %v700_v6, %v2731_v48  ;;  %v715_v14 = vcombine.low %v692_v61, %v707_v7  ;;  %v716_v15 = vcombine.high %v692_v61, %v707_v7  ;;  %v1140_v16 = vpack.i.b16 %v1113_v12, %v2719_v33 }
 0x1b8   : > { %v766_v17 = vcombine.high %v551_v8, %v2729_v44  ;;  %v773_v18 = vrot.slane %v551_v8, %v2731_v48  ;;  %v2754_v19 = vrot.slane %v553_v10, %v2731_v48  ;;  %v619_v20 = vcombine.high %v521_v9, %v2729_v44 }
 0x1b9   : > { %v723_v21 = vrot.slane %v715_v14, %v2734_v54  ;;  %v730_v22 = vrot.slane %v716_v15, %v2734_v54  ;;  %v731_v23 = vcombine.low %v699_v0, %v714_v13  ;;  %v732_v24 = vcombine.high %v699_v0, %v714_v13 }
 0x1ba   : > { %v780_v25 = vrot.slane %v766_v17, %v2731_v48  ;;  %v781_v26 = vcombine.low %v758_v4, %v773_v18  ;;  %v782_v27 = vcombine.high %v758_v4, %v773_v18  ;;  %v2761_v28 = vrot.slane %v521_v9, %v2731_v48  ;;  %v2773_v50 = vpop.permute.xlu1 %1116  ;;  %v1111_v62 = vpop.permute.xlu0 %1110 }
 0x1bb   : > { %v739_v30 = vrot.slane %v731_v23, %v2734_v54  ;;  %v746_v31 = vrot.slane %v732_v24, %v2734_v54  ;;  %v917_v32 = vcombine.low %v723_v21, %v730_v22  ;;  %v2107_v34 = vcombine.high %v723_v21, %v730_v22 }
 0x1bc   : > { %v789_v36 = vrot.slane %v781_v26, %v2734_v54  ;;  %v796_v37 = vrot.slane %v782_v27, %v2734_v54  ;;  %v797_v38 = vcombine.low %v765_v5, %v780_v25  ;;  %v798_v39 = vcombine.high %v765_v5, %v780_v25 }
 0x1bd   : > { %v924_v40 = vrot.slane %v917_v32, %v2731_v48  ;;  %v932_v41 = vrot.slane %v2107_v34, %v2731_v48  ;;  %v933_v42 = vcombine.low %v739_v30, %v746_v31  ;;  %v2108_v43 = vcombine.high %v739_v30, %v746_v31 }
 0x1be   : > { %v805_v45 = vrot.slane %v797_v38, %v2734_v54  ;;  %v812_v46 = vrot.slane %v798_v39, %v2734_v54  ;;  %v967_v47 = vcombine.low %v789_v36, %v796_v37  ;;  %v2109_v49 = vcombine.high %v789_v36, %v796_v37  ;;  %v2808_v24 = vpop.permute.xlu0 %1114 }
 0x1bf   : > { %v940_v51 = vrot.slane %v933_v42, %v2731_v48  ;;  %v948_v52 = vrot.slane %v2108_v43, %v2731_v48  ;;  %v949_v53 = vcombine.low %v924_v40, %v932_v41  ;;  %v2778_v55 = vrot.slane %v619_v20, %v2731_v48 }
 0x1c0   : > { %v974_v56 = vrot.slane %v967_v47, %v2731_v48  ;;  %v982_v57 = vrot.slane %v2109_v49, %v2731_v48  ;;  %v983_v60 = vcombine.low %v805_v45, %v812_v46  ;;  %v2110_v61 = vcombine.high %v805_v45, %v812_v46 }
 0x1c1   : > { %v956_v63 = vrot.slane %v949_v53, %v2734_v54  ;;  %v957_v0 = vcombine.low %v940_v51, %v948_v52  ;;  %v1143_v1 = vshrl.u32 %v1113_v12, 16  ;;  %v1286_v2 = vcombine.high %v1140_v16, %v2729_v44 }
 0x1c2   : > { %v990_v3 = vrot.slane %v983_v60, %v2731_v48  ;;  %v998_v4 = vrot.slane %v2110_v61, %v2731_v48  ;;  %v999_v5 = vcombine.low %v974_v56, %v982_v57  ;;  %v2787_v6 = vrot.slane %v1140_v16, %v2731_v48  ;;  %v508_v16 = vpop.permute.xlu1 %507 }
 0x1c3   : > { %v964_v7 = vrot.slane %v957_v0, %v2734_v54  ;;  %v1144_v8 = vpack.i.b16 %v1143_v1, %v1142_v58  ;;  %v2793_v9 = vrot.slane %v1286_v2, %v2731_v48  ;;  %v528_v10 = vshrl.u32 %v2763_v29, 16  ;;  %v2840_v2 = vpop.permute.xlu0 %1118 }
 0x1c4   : > { %v1006_v12 = vrot.slane %v999_v5, %v2734_v54  ;;  %v1007_v13 = vcombine.low %v990_v3, %v998_v4  ;;  %v1150_v14 = vshrl.u32 %v2773_v50, 16  ;;  %v1124_v15 = vpack.i.b16 %v1111_v62, %v2722_v35 }
 0x1c5   : > { %v965_v17 = vcombine.low %v956_v63, %v964_v7  ;;  %v966_v18 = vcombine.high %v956_v63, %v964_v7  ;;  %v1352_v20 = vcombine.high %v1144_v8, %v2729_v44  ;;  %v2801_v33 = vrot.slane %v1144_v8, %v2731_v48 }
 0x1c6   : > { %v1014_v58 = vrot.slane %v1007_v13, %v2734_v54  ;;  %v1127_v21 = vshrl.u32 %v1111_v62, 16  ;;  %v1154_v22 = vcombine.high %v1124_v15, %v2729_v44  ;;  %v2806_v23 = vrot.slane %v1124_v15, %v2731_v48  ;;  %v1121_v61 = vpop.permute.xlu1 %1120 }
 0x1c7   : > { %v1032_v25 = vshrl.u32 %v965_v17, 16  ;;  %v1038_v26 = vshrl.u32 %v966_v18, 16  ;;  %v2811_v27 = vrot.slane %v1352_v20, %v2731_v48  ;;  %v525_v30 = vpack.i.b16 %v2763_v29, %v508_v16 }
 0x1c8   : > { %v1015_v31 = vcombine.low %v1006_v12, %v1014_v58  ;;  %v1016_v32 = vcombine.high %v1006_v12, %v1014_v58  ;;  %v1128_v34 = vpack.i.b16 %v1127_v21, %v1126_v59  ;;  %v2818_v36 = vrot.slane %v1154_v22, %v2731_v48 }
 0x1c9   : > { %v527_v37 = vshrl.u32 %v508_v16, 16  ;;  %v568_v38 = vcombine.high %v525_v30, %v2729_v44  ;;  %v575_v39 = vrot.slane %v525_v30, %v2731_v48  ;;  %v1134_v40 = vshrl.u32 %v2808_v24, 16 }
 0x1ca   : > { %v1031_v41 = vpack.i.b16 %v1015_v31, %v965_v17  ;;  %v1033_v42 = vshrl.u32 %v1015_v31, 16  ;;  %v1037_v43 = vpack.i.b16 %v1016_v32, %v966_v18  ;;  %v1039_v29 = vshrl.u32 %v1016_v32, 16 }
 0x1cb   : > { %v1220_v45 = vcombine.high %v1128_v34, %v2729_v44  ;;  %v2825_v46 = vrot.slane %v1128_v34, %v2731_v48  ;;  %v529_v35 = vpack.i.b16 %v528_v10, %v527_v37  ;;  %v582_v59 = vrot.slane %v568_v38, %v2731_v48 }
 0x1cc   : > { %v1034_v47 = vpack.i.b16 %v1033_v42, %v1032_v25  ;;  %v1040_v49 = vpack.i.b16 %v1039_v29, %v1038_v26  ;;  %v2113_v51 = vcombine.low %v1031_v41, %v1031_v41  ;;  %v2114_v52 = vcombine.high %v1031_v41, %v1031_v41 }
 0x1cd   : > { %v2121_v53 = vcombine.low %v1037_v43, %v1037_v43  ;;  %v2122_v56 = vcombine.high %v1037_v43, %v1037_v43  ;;  %v2829_v57 = vrot.slane %v1220_v45, %v2731_v48  ;;  %v583_v60 = vcombine.low %v2747_v11, %v575_v39 }
 0x1ce   : > { %v2117_v62 = vcombine.low %v1034_v47, %v1034_v47  ;;  %v2118_v63 = vcombine.high %v1034_v47, %v1034_v47  ;;  %v2125_v0 = vcombine.low %v1040_v49, %v1040_v49  ;;  %v2126_v1 = vcombine.high %v1040_v49, %v1040_v49  ;;  %1092 = vst.msk [vmem:[%s2834_s30 + $0x8] sm:$0xf] %vm1089_vm1, %v2113_v51 }
 0x1cf   : > { %1093 = vst.msk [vmem:[%s2834_s30 + $0xc] sm:$0xf] %vm1089_vm1, %v2114_v52  ;;  %1100 = vst.msk [vmem:[%s2834_s30 + $0x28] sm:$0xf] %vm1089_vm1, %v2121_v53  ;;  %v584_v3 = vcombine.high %v2747_v11, %v575_v39  ;;  %v591_v4 = vrot.slane %v583_v60, %v2734_v54  ;;  %v599_v5 = vcombine.low %v2754_v19, %v582_v59  ;;  %v1151_v12 = vshrl.u32 %v1121_v61, 16 }
 0x1d0   : > { %1101 = vst.msk [vmem:[%s2834_s30 + $0x2c] sm:$0xf] %vm1089_vm1, %v2122_v56  ;;  %v600_v7 = vcombine.high %v2754_v19, %v582_v59  ;;  %1096 = vst.msk [vmem:[%s2834_s30 + $0x18] sm:$0xf] %vm1089_vm1, %v2117_v62  ;;  %v634_v8 = vcombine.high %v529_v35, %v2729_v44  ;;  %v641_v10 = vrot.slane %v529_v35, %v2731_v48 }
 0x1d1   : > { %1097 = vst.msk [vmem:[%s2834_s30 + $0x1c] sm:$0xf] %vm1089_vm1, %v2118_v63  ;;  %1104 = vst.msk [vmem:[%s2834_s30 + $0x38] sm:$0xf] %vm1089_vm1, %v2125_v0  ;;  %v1148_v11 = vpack.i.b16 %v1121_v61, %v2773_v50  ;;  %v598_v13 = vrot.slane %v584_v3, %v2734_v54  ;;  %v607_v15 = vrot.slane %v599_v5, %v2734_v54 }
 0x1d2   : > { %1105 = vst.msk [vmem:[%s2834_s30 + $0x3c] sm:$0xf] %vm1089_vm1, %v2126_v1  ;;  %v614_v19 = vrot.slane %v600_v7, %v2734_v54  ;;  %v2866_v16 = vpack.i.b16 %v2840_v2, %v2808_v24  ;;  %v648_v17 = vrot.slane %v634_v8, %v2731_v48  ;;  %v649_v18 = vcombine.low %v2761_v28, %v641_v10 }
 0x1d3   : > { %v650_v20 = vcombine.high %v2761_v28, %v641_v10  ;;  %v1152_v58 = vpack.i.b16 %v1151_v12, %v1150_v14  ;;  %v817_v21 = vcombine.low %v591_v4, %v598_v13  ;;  %v2103_v22 = vcombine.high %v591_v4, %v598_v13 }
 0x1d4   : > { %v833_v25 = vcombine.low %v607_v15, %v614_v19  ;;  %v2104_v26 = vcombine.high %v607_v15, %v614_v19  ;;  %v657_v30 = vrot.slane %v649_v18, %v2734_v54  ;;  %v665_v32 = vcombine.low %v2778_v55, %v648_v17 }
 0x1d5   : > { %v664_v31 = vrot.slane %v650_v20, %v2734_v54  ;;  %v666_v34 = vcombine.high %v2778_v55, %v648_v17  ;;  %v824_v37 = vrot.slane %v817_v21, %v2731_v48  ;;  %v832_v38 = vrot.slane %v2103_v22, %v2731_v48 }
 0x1d6   : > { %v840_v28 = vrot.slane %v833_v25, %v2731_v48  ;;  %v848_v50 = vrot.slane %v2104_v26, %v2731_v48  ;;  %v673_v14 = vrot.slane %v665_v32, %v2734_v54  ;;  %v1301_v45 = vcombine.high %v1148_v11, %v2729_v44 }
 0x1d7   : > { %v680_v39 = vrot.slane %v666_v34, %v2734_v54  ;;  %v867_v41 = vcombine.low %v657_v30, %v664_v31  ;;  %v2105_v42 = vcombine.high %v657_v30, %v664_v31  ;;  %v849_v43 = vcombine.low %v824_v37, %v832_v38 }
 0x1d8   : > { %v857_v29 = vcombine.low %v840_v28, %v848_v50  ;;  %v1308_v55 = vrot.slane %v1148_v11, %v2731_v48  ;;  %v1315_v53 = vrot.slane %v1301_v45, %v2731_v48  ;;  %v1367_v15 = vcombine.high %v1152_v58, %v2729_v44 }
 0x1d9   : > { %v874_v35 = vrot.slane %v867_v41, %v2731_v48  ;;  %v882_v59 = vrot.slane %v2105_v42, %v2731_v48  ;;  %v883_v47 = vcombine.low %v673_v14, %v680_v39  ;;  %v2106_v49 = vcombine.high %v673_v14, %v680_v39 }
 0x1da   : > { %v856_v51 = vrot.slane %v849_v43, %v2734_v54  ;;  %v864_v52 = vrot.slane %v857_v29, %v2734_v54  ;;  %v1316_v56 = vcombine.low %v2787_v6, %v1308_v55  ;;  %v1317_v63 = vcombine.high %v2787_v6, %v1308_v55 }
 0x1db   : > { %v890_v60 = vrot.slane %v883_v47, %v2731_v48  ;;  %v898_v61 = vrot.slane %v2106_v49, %v2731_v48  ;;  %v899_v62 = vcombine.low %v874_v35, %v882_v59  ;;  %v1332_v4 = vcombine.low %v2793_v9, %v1315_v53 }
 0x1dc   : > { %v865_v0 = vcombine.low %v856_v51, %v864_v52  ;;  %v866_v1 = vcombine.high %v856_v51, %v864_v52  ;;  %v1324_v3 = vrot.slane %v1316_v56, %v2734_v54  ;;  %v1331_v8 = vrot.slane %v1317_v63, %v2734_v54 }
 0x1dd   : > { %v906_v5 = vrot.slane %v899_v62, %v2734_v54  ;;  %v907_v7 = vcombine.low %v890_v60, %v898_v61  ;;  %v1333_v10 = vcombine.high %v2793_v9, %v1315_v53  ;;  %v1340_v13 = vrot.slane %v1332_v4, %v2734_v54 }
 0x1de   : > { %v1020_v11 = vshrl.u32 %v865_v0, 16  ;;  %v1026_v12 = vshrl.u32 %v866_v1, 16  ;;  %v1374_v17 = vrot.slane %v1152_v58, %v2731_v48  ;;  %v1518_v18 = vcombine.low %v1324_v3, %v1331_v8 }
 0x1df   : > { %v914_v6 = vrot.slane %v907_v7, %v2734_v54  ;;  %v1347_v19 = vrot.slane %v1333_v10, %v2734_v54  ;;  %v1381_v20 = vrot.slane %v1367_v15, %v2731_v48  ;;  %v2131_v21 = vcombine.high %v1324_v3, %v1331_v8 }
 0x1e0   : > { %v1135_v22 = vshrl.u32 %v2840_v2, 16  ;;  %v1169_v9 = vcombine.high %v2866_v16, %v2729_v44  ;;  %v1382_v30 = vcombine.low %v2801_v33, %v1374_v17  ;;  %v1383_v31 = vcombine.high %v2801_v33, %v1374_v17 }
 0x1e1   : > { %v915_v25 = vcombine.low %v906_v5, %v914_v6  ;;  %v916_v26 = vcombine.high %v906_v5, %v914_v6  ;;  %v1398_v32 = vcombine.low %v2811_v27, %v1381_v20  ;;  %v1399_v34 = vcombine.high %v2811_v27, %v1381_v20 }
 0x1e2   : > { %v1525_v58 = vrot.slane %v1518_v18, %v2731_v48  ;;  %v1533_v37 = vrot.slane %v2131_v21, %v2731_v48  ;;  %v1390_v14 = vrot.slane %v1382_v30, %v2734_v54  ;;  %v1397_v39 = vrot.slane %v1383_v31, %v2734_v54 }
 0x1e3   : > { %v1019_v38 = vpack.i.b16 %v915_v25, %v865_v0  ;;  %v1021_v28 = vshrl.u32 %v915_v25, 16  ;;  %v1025_v2 = vpack.i.b16 %v916_v26, %v866_v1  ;;  %v1027_v50 = vshrl.u32 %v916_v26, 16 }
 0x1e4   : > { %v1406_v33 = vrot.slane %v1398_v32, %v2734_v54  ;;  %v1413_v41 = vrot.slane %v1399_v34, %v2734_v54  ;;  %v1534_v35 = vcombine.low %v1340_v13, %v1347_v19  ;;  %v2132_v59 = vcombine.high %v1340_v13, %v1347_v19 }
 0x1e5   : > { %v1022_v27 = vpack.i.b16 %v1021_v28, %v1020_v11  ;;  %v1028_v42 = vpack.i.b16 %v1027_v50, %v1026_v12  ;;  %v2111_v43 = vcombine.low %v1019_v38, %v1019_v38  ;;  %v2112_v29 = vcombine.high %v1019_v38, %v1019_v38 }
 0x1e6   : > { %v2119_v45 = vcombine.low %v1025_v2, %v1025_v2  ;;  %v2120_v55 = vcombine.high %v1025_v2, %v1025_v2  ;;  %v1541_v53 = vrot.slane %v1534_v35, %v2731_v48  ;;  %v1549_v56 = vrot.slane %v2132_v59, %v2731_v48 }
 0x1e7   : > { %v2115_v47 = vcombine.low %v1022_v27, %v1022_v27  ;;  %v2116_v49 = vcombine.high %v1022_v27, %v1022_v27  ;;  %v2123_v51 = vcombine.low %v1028_v42, %v1028_v42  ;;  %v2124_v52 = vcombine.high %v1028_v42, %v1028_v42  ;;  %1090 = vst.msk [vmem:[%s2834_s30] sm:$0xf] %vm1089_vm1, %v2111_v43 }
 0x1e8   : > { %1091 = vst.msk [vmem:[%s2834_s30 + $0x4] sm:$0xf] %vm1089_vm1, %v2112_v29  ;;  %1098 = vst.msk [vmem:[%s2834_s30 + $0x20] sm:$0xf] %vm1089_vm1, %v2119_v45  ;;  %v1550_v60 = vcombine.low %v1525_v58, %v1533_v37  ;;  %v1568_v61 = vcombine.low %v1390_v14, %v1397_v39  ;;  %v2133_v62 = vcombine.high %v1390_v14, %v1397_v39 }
 0x1e9   : > { %1099 = vst.msk [vmem:[%s2834_s30 + $0x24] sm:$0xf] %vm1089_vm1, %v2120_v55  ;;  %1094 = vst.msk [vmem:[%s2834_s30 + $0x10] sm:$0xf] %vm1089_vm1, %v2115_v47  ;;  %v1584_v63 = vcombine.low %v1406_v33, %v1413_v41  ;;  %v2134_v0 = vcombine.high %v1406_v33, %v1413_v41  ;;  %v1136_v1 = vpack.i.b16 %v1135_v22, %v1134_v40 }
 0x1ea   : > { %1095 = vst.msk [vmem:[%s2834_s30 + $0x14] sm:$0xf] %vm1089_vm1, %v2116_v49  ;;  %1102 = vst.msk [vmem:[%s2834_s30 + $0x30] sm:$0xf] %vm1089_vm1, %v2123_v51  ;;  %v1557_v3 = vrot.slane %v1550_v60, %v2734_v54  ;;  %v1558_v4 = vcombine.low %v1541_v53, %v1549_v56  ;;  %v1575_v5 = vrot.slane %v1568_v61, %v2731_v48 }
 0x1eb   : > { %1103 = vst.msk [vmem:[%s2834_s30 + $0x34] sm:$0xf] %vm1089_vm1, %v2124_v52  ;;  %v1176_v7 = vrot.slane %v2866_v16, %v2731_v48  ;;  %v1583_v8 = vrot.slane %v2133_v62, %v2731_v48  ;;  %v1591_v10 = vrot.slane %v1584_v63, %v2731_v48  ;;  %v1599_v11 = vrot.slane %v2134_v0, %v2731_v48 }
 0x1ec   : > { %v1183_v12 = vrot.slane %v1169_v9, %v2731_v48  ;;  %v1565_v13 = vrot.slane %v1558_v4, %v2734_v54  ;;  %v1235_v15 = vcombine.high %v1136_v1, %v2729_v44  ;;  %v1242_v31 = vrot.slane %v1136_v1, %v2731_v48 }
 0x1ed   : > { %v1184_v24 = vcombine.low %v2806_v23, %v1176_v7  ;;  %v1185_v40 = vcombine.high %v2806_v23, %v1176_v7  ;;  %v1600_v6 = vcombine.low %v1575_v5, %v1583_v8  ;;  %v1608_v19 = vcombine.low %v1591_v10, %v1599_v11 }
 0x1ee   : > { %v1200_v16 = vcombine.low %v2818_v36, %v1183_v12  ;;  %v1201_v17 = vcombine.high %v2818_v36, %v1183_v12  ;;  %v1566_v18 = vcombine.low %v1557_v3, %v1565_v13  ;;  %v1567_v20 = vcombine.high %v1557_v3, %v1565_v13 }
 0x1ef   : > { %v1192_v21 = vrot.slane %v1184_v24, %v2734_v54  ;;  %v1199_v22 = vrot.slane %v1185_v40, %v2734_v54  ;;  %v1607_v9 = vrot.slane %v1600_v6, %v2734_v54  ;;  %v1615_v25 = vrot.slane %v1608_v19, %v2734_v54 }
 0x1f0   : > { %v1208_v23 = vrot.slane %v1200_v16, %v2734_v54  ;;  %v1215_v44 = vrot.slane %v1201_v17, %v2734_v54  ;;  %v1633_v26 = vshrl.u32 %v1566_v18, 16  ;;  %v1639_v30 = vshrl.u32 %v1567_v20, 16 }
 0x1f1   : > { %v1249_v36 = vrot.slane %v1235_v15, %v2731_v48  ;;  %v1616_v32 = vcombine.low %v1607_v9, %v1615_v25  ;;  %v1617_v34 = vcombine.high %v1607_v9, %v1615_v25  ;;  %v1418_v58 = vcombine.low %v1192_v21, %v1199_v22 }
 0x1f2   : > { %v2127_v37 = vcombine.high %v1192_v21, %v1199_v22  ;;  %v1250_v38 = vcombine.low %v2825_v46, %v1242_v31  ;;  %v1251_v28 = vcombine.high %v2825_v46, %v1242_v31  ;;  %v1434_v60 = vcombine.low %v1208_v23, %v1215_v44 }
 0x1f3   : > { %v1266_v2 = vcombine.low %v2829_v57, %v1249_v36  ;;  %v1267_v50 = vcombine.high %v2829_v57, %v1249_v36  ;;  %v1632_v14 = vpack.i.b16 %v1616_v32, %v1566_v18  ;;  %v1634_v39 = vshrl.u32 %v1616_v32, 16 }
 0x1f4   : > { %v1638_v33 = vpack.i.b16 %v1617_v34, %v1567_v20  ;;  %v1640_v41 = vshrl.u32 %v1617_v34, 16  ;;  %v1258_v27 = vrot.slane %v1250_v38, %v2734_v54  ;;  %v1265_v42 = vrot.slane %v1251_v28, %v2734_v54  ;;  %v1738_v38 = vld [vmem:[%s2834_s30] sm:$0xff] (%p2657_p0)   ;;  %v1742_v28 = vld [vmem:[%s2834_s30 + $0x8] sm:$0xff] (%p2657_p0)  }
 0x1f5   : > { %v1274_v43 = vrot.slane %v1266_v2, %v2734_v54  ;;  %v1281_v29 = vrot.slane %v1267_v50, %v2734_v54  ;;  %v1635_v45 = vpack.i.b16 %v1634_v39, %v1633_v26  ;;  %v2137_v46 = vcombine.low %v1632_v14, %v1632_v14  ;;  %v1746_v2 = vld [vmem:[%s2834_s30 + $0x10] sm:$0xff] (%p2657_p0)   ;;  %v1750_v50 = vld [vmem:[%s2834_s30 + $0x18] sm:$0xff] (%p2657_p0)   ;;  %v1758_v39 = vld [vmem:[%s2834_s30 + $0x28] sm:$0xff] (%p2657_p0)   ;;  %1739 = vst [vmem:[%s1721_s15] sm:$0xff] (%p2657_p0), %v1738_v38  }
 0x1f6   : > { %v1641_v55 = vpack.i.b16 %v1640_v41, %v1639_v30  ;;  %v2138_v35 = vcombine.high %v1632_v14, %v1632_v14  ;;  %v2145_v59 = vcombine.low %v1638_v33, %v1638_v33  ;;  %v2146_v47 = vcombine.high %v1638_v33, %v1638_v33  ;;  %v1754_v14 = vld [vmem:[%s2834_s30 + $0x20] sm:$0xff] (%p2657_p0)   ;;  %v1762_v33 = vld [vmem:[%s2834_s30 + $0x30] sm:$0xff] (%p2657_p0)   ;;  %v1766_v41 = vld [vmem:[%s2834_s30 + $0x38] sm:$0xff] (%p2657_p0)   ;;  %1743 = vst [vmem:[%s1721_s15 + $0x8] sm:$0xff] (%p2657_p0), %v1742_v28  }
 0x1f7   : > { %v1425_v57 = vrot.slane %v1418_v58, %v2731_v48  ;;  %v1433_v49 = vrot.slane %v2127_v37, %v2731_v48  ;;  %v2141_v51 = vcombine.low %v1635_v45, %v1635_v45  ;;  %v2142_v52 = vcombine.high %v1635_v45, %v1635_v45  ;;  %1692 = vst.msk [vmem:[%s2972_s7 + $0x8] sm:$0xf] %vm1089_vm1, %v2137_v46 }
 0x1f8   : > { %v2149_v53 = vcombine.low %v1641_v55, %v1641_v55  ;;  %v2150_v56 = vcombine.high %v1641_v55, %v1641_v55  ;;  %1693 = vst.msk [vmem:[%s2972_s7 + $0xc] sm:$0xf] %vm1089_vm1, %v2138_v35  ;;  %1700 = vst.msk [vmem:[%s2972_s7 + $0x28] sm:$0xf] %vm1089_vm1, %v2145_v59  ;;  %v2128_v61 = vcombine.high %v1208_v23, %v1215_v44 }
 0x1f9   : > { %1701 = vst.msk [vmem:[%s2972_s7 + $0x2c] sm:$0xf] %vm1089_vm1, %v2146_v47  ;;  %v1450_v62 = vcombine.low %v1425_v57, %v1433_v49  ;;  %v1468_v63 = vcombine.low %v1258_v27, %v1265_v42  ;;  %1696 = vst.msk [vmem:[%s2972_s7 + $0x18] sm:$0xf] %vm1089_vm1, %v2141_v51  ;;  %v2129_v0 = vcombine.high %v1258_v27, %v1265_v42 }
 0x1fa   : > { %1697 = vst.msk [vmem:[%s2972_s7 + $0x1c] sm:$0xf] %vm1089_vm1, %v2142_v52  ;;  %1704 = vst.msk [vmem:[%s2972_s7 + $0x38] sm:$0xf] %vm1089_vm1, %v2149_v53  ;;  %v1484_v1 = vcombine.low %v1274_v43, %v1281_v29  ;;  %v2130_v3 = vcombine.high %v1274_v43, %v1281_v29  ;;  %v1441_v4 = vrot.slane %v1434_v60, %v2731_v48 }
 0x1fb   : > { %1705 = vst.msk [vmem:[%s2972_s7 + $0x3c] sm:$0xf] %vm1089_vm1, %v2150_v56  ;;  %v1449_v5 = vrot.slane %v2128_v61, %v2731_v48  ;;  %v1457_v7 = vrot.slane %v1450_v62, %v2734_v54  ;;  %v1475_v8 = vrot.slane %v1468_v63, %v2731_v48  ;;  %v1483_v10 = vrot.slane %v2129_v0, %v2731_v48 }
 0x1fc   : > { %v1491_v11 = vrot.slane %v1484_v1, %v2731_v48  ;;  %v1499_v12 = vrot.slane %v2130_v3, %v2731_v48  ;;  %1747 = vst [vmem:[%s1721_s15 + $0x20] sm:$0xff] (%p2657_p0), %v1746_v2   ;;  %1751 = vst [vmem:[%s1721_s15 + $0x28] sm:$0xff] (%p2657_p0), %v1750_v50  }
 0x1fd   : > { %v1458_v13 = vcombine.low %v1441_v4, %v1449_v5  ;;  %v1500_v24 = vcombine.low %v1475_v8, %v1483_v10  ;;  %1755 = vst [vmem:[%s1721_s15 + $0x40] sm:$0xff] (%p2657_p0), %v1754_v14   ;;  %1759 = vst [vmem:[%s1721_s15 + $0x48] sm:$0xff] (%p2657_p0), %v1758_v39  }
 0x1fe   : > { %v1508_v40 = vcombine.low %v1491_v11, %v1499_v12  ;;  %1763 = vst [vmem:[%s1721_s15 + $0x60] sm:$0xff] (%p2657_p0), %v1762_v33   ;;  %1767 = vst [vmem:[%s1721_s15 + $0x68] sm:$0xff] (%p2657_p0), %v1766_v41  }
 0x1ff   : > { %v1465_v15 = vrot.slane %v1458_v13, %v2734_v54  ;;  %v1507_v6 = vrot.slane %v1500_v24, %v2734_v54 }
 0x200   : > { %v1515_v19 = vrot.slane %v1508_v40, %v2734_v54 }
 0x201   : > { %v1466_v16 = vcombine.low %v1457_v7, %v1465_v15  ;;  %v1467_v17 = vcombine.high %v1457_v7, %v1465_v15 }
 0x202   : > { %v1516_v18 = vcombine.low %v1507_v6, %v1515_v19  ;;  %v1517_v20 = vcombine.high %v1507_v6, %v1515_v19 }
 0x203   : > { %v1621_v21 = vshrl.u32 %v1466_v16, 16  ;;  %v1627_v22 = vshrl.u32 %v1467_v17, 16 }
 0x204   : > { %v1620_v9 = vpack.i.b16 %v1516_v18, %v1466_v16  ;;  %v1622_v48 = vshrl.u32 %v1516_v18, 16  ;;  %v1626_v25 = vpack.i.b16 %v1517_v20, %v1467_v17  ;;  %v1628_v23 = vshrl.u32 %v1517_v20, 16 }
 0x206   : > { %v1623_v44 = vpack.i.b16 %v1622_v48, %v1621_v21  ;;  %v1629_v26 = vpack.i.b16 %v1628_v23, %v1627_v22  ;;  %v2135_v54 = vcombine.low %v1620_v9, %v1620_v9  ;;  %v2136_v30 = vcombine.high %v1620_v9, %v1620_v9 }
 0x207   : > { %v2143_v31 = vcombine.low %v1626_v25, %v1626_v25  ;;  %v2144_v36 = vcombine.high %v1626_v25, %v1626_v25 }
 0x208   : > { %v2139_v32 = vcombine.low %v1623_v44, %v1623_v44  ;;  %v2140_v34 = vcombine.high %v1623_v44, %v1623_v44  ;;  %v2147_v58 = vcombine.low %v1629_v26, %v1629_v26  ;;  %v2148_v37 = vcombine.high %v1629_v26, %v1629_v26  ;;  %1690 = vst.msk [vmem:[%s2972_s7] sm:$0xf] %vm1089_vm1, %v2135_v54  ;;  %1716 = sbr.rel (!%p2657_p0) target bundleno = 525 (0x20d), region = 56 }
 0x209   : > { %1691 = vst.msk [vmem:[%s2972_s7 + $0x4] sm:$0xf] %vm1089_vm1, %v2136_v30  ;;  %1698 = vst.msk [vmem:[%s2972_s7 + $0x20] sm:$0xf] %vm1089_vm1, %v2143_v31 }
 0x20a   : > { %1699 = vst.msk [vmem:[%s2972_s7 + $0x24] sm:$0xf] %vm1089_vm1, %v2144_v36  ;;  %1694 = vst.msk [vmem:[%s2972_s7 + $0x10] sm:$0xf] %vm1089_vm1, %v2139_v32 }
 0x20b   : > { %1695 = vst.msk [vmem:[%s2972_s7 + $0x14] sm:$0xf] %vm1089_vm1, %v2140_v34  ;;  %1702 = vst.msk [vmem:[%s2972_s7 + $0x30] sm:$0xf] %vm1089_vm1, %v2147_v58 }
 0x20c   : > { %1703 = vst.msk [vmem:[%s2972_s7 + $0x34] sm:$0xf] %vm1089_vm1, %v2148_v37 }
 0x20d PF: > { %1825 = sbr.rel (!%p2657_p0) target bundleno = 537 (0x219), region = 97  ;;  %s2156_s2 = sshll.u32 (%p2657_p0), %s2481_s21, 2  ;;  %v1851_v42 = vld [vmem:[%s2972_s7 + $0x8] sm:$0xff] (%p2657_p0)   ;;  %v1859_v29 = vld [vmem:[%s2972_s7 + $0x18] sm:$0xff] (%p2657_p0)  }
 0x20e   : > { %s2157_s3 = sshll.u32 (%p2657_p0), %s2485_s22, 5  ;;  %v1867_v55 = vld [vmem:[%s2972_s7 + $0x28] sm:$0xff] (%p2657_p0)   ;;  %v1875_v35 = vld [vmem:[%s2972_s7 + $0x38] sm:$0xff] (%p2657_p0)   ;;  %s3104_s6 = sld [smem:[#allocation19_spill]] (%p2657_p0) }
 0x20f   : > { %s1828_s13 = sadd.s32 (%p2657_p0), %s2157_s3, %s2156_s2 }
 0x210   : > { %v1847_v27 = vld [vmem:[%s2972_s7] sm:$0xff] (%p2657_p0)   ;;  %s2158_s17 = sshll.u32 (%p2657_p0), %s1828_s13, 2 }
 0x211   : > { %v1863_v45 = vld [vmem:[%s2972_s7 + $0x20] sm:$0xff] (%p2657_p0)  }
 0x212   : > { %v1855_v43 = vld [vmem:[%s2972_s7 + $0x10] sm:$0xff]  }
 0x213   : > { %v1871_v46 = vld [vmem:[%s2972_s7 + $0x30] sm:$0xff]  }
 0x214   : > { %s1830_s4 = scalar_lea.vmem %s3104_s6, %s2158_s17 }
 0x215   : > { %1848 = vst [vmem:[%s1830_s4] sm:$0xff] %v1847_v27   ;;  %1852 = vst [vmem:[%s1830_s4 + $0x8] sm:$0xff] %v1851_v42  }
 0x216   : > { %1856 = vst [vmem:[%s1830_s4 + $0x20] sm:$0xff] %v1855_v43   ;;  %1860 = vst [vmem:[%s1830_s4 + $0x28] sm:$0xff] %v1859_v29  }
 0x217   : > { %1864 = vst [vmem:[%s1830_s4 + $0x40] sm:$0xff] %v1863_v45   ;;  %1868 = vst [vmem:[%s1830_s4 + $0x48] sm:$0xff] %v1867_v55  }
 0x218   : > { %1872 = vst [vmem:[%s1830_s4 + $0x60] sm:$0xff] %v1871_v46   ;;  %1876 = vst [vmem:[%s1830_s4 + $0x68] sm:$0xff] %v1875_v35  }
 0x219 PF: > { %s21_s25 = sadd.s32 1, %s2497_s25   ;;  %s3105_s5 = sld [smem:[#allocation14_spill]] }
 0x21a   : > { %p18_p6 = scmp.ge.s32.totalorder %s21_s25, 6   ;;  %s3106_s18 = smov %s2473_s19 }
 0x21b   : > { %s3107_s19 = smov %s2477_s20  ;;  %s3108_s20 = smov %s2670_s1 }
 0x21c   : > { %s3109_s21 = smov %s2489_s23  ;;  %s3110_s22 = smov %s2493_s24 }
 0x21d   : > { %s3112_s24 = smov %s3118_s14  ;;  %20 = sbr.rel (!%p18_p6) target bundleno = 13 (0xd), region = 182 }
 0x21f   : > { %s3111_s23 = smov %s3105_s5 }
 0x222   :  { %1951 = vsyncpa [#allocation3], 1 }
 0x223   :  { %1953 = vsyncpa [#allocation3 + $0x1], 1 }
 0x224   :  { %1954 = vsyncpa [#allocation5], 1 }
 0x225   :  { %1955 = vsyncpa [#allocation8], 1 }

</bundles_post_ra>
